<compile_context>
chip_gen: v5e
topology: v5e:2x2
jax: 0.10.0
libtpu: 0.0.40
codegen_flags: <defaults>
</compile_context>

<pallas_src>
import functools

import jax
import jax.numpy as jnp
from jax import lax
from jax.experimental import pallas as pl
from jax.experimental.pallas import tpu as pltpu


def _round_up(x, m):
    return (x + m - 1) // m * m


def _conv_bn_relu_kernel(x_ref, w_ref, o_ref):
    """One grid step = one lane tile of the fused conv-as-GEMM.

    x_ref: (K, Lt)    bf16  im2col'd activations + trailing all-ones row
    w_ref: (Cout, K)  bf16  BN-scale-folded weights + trailing BN-shift column
    o_ref: (Cout, Lt) f32   lane-dense output tile (unmasked vst)
    """
    acc = jnp.dot(w_ref[...], x_ref[...], preferred_element_type=jnp.float32)
    o_ref[...] = jnp.maximum(acc, 0.0)


@functools.partial(jax.jit, static_argnames=("stride", "padding", "eps"))
def basic_conv2d(x, weight, bias, gamma, beta, running_mean, running_var,
                 *, stride=1, padding=1, eps=1e-3):
    """Forward of _BasicConv2d (eval-mode BN).

    x: (N, Cin, H, W) NCHW; weight: (Cout, Cin, KH, KW).
    """
    if stride != 1:
        raise NotImplementedError("only stride=1 is implemented")  # TODO(synk)

    N, Cin, H, W = x.shape
    Cout, Cin_w, KH, KW = weight.shape
    assert Cin_w == Cin

    Hp, Wp = H + 2 * padding, W + 2 * padding
    Ho, Wo = Hp - KH + 1, Wp - KW + 1

    # Output lane layout per image: column m = oh*Wp + ow ("Wp-stride" trick);
    # columns with ow >= Wo or m >= Ho*Wp are garbage and sliced off below.
    M = _round_up(Ho * Wp, 128)                 # lanes per image
    Lf = M + (KH - 1) * Wp + (KW - 1)           # flat padded length for tap shifts

    # ---- wrapper glue (fused under jit; no NCHW<->NHWC transposes) ----------
    xpad = jnp.pad(x, ((0, 0), (0, 0), (padding, padding), (padding, padding)))
    xflat = xpad.reshape(N, Cin, Hp * Wp)
    xflat = jnp.pad(xflat, ((0, 0), (0, 0), (0, Lf - Hp * Wp)))

    # im2col: row (kh, kw, cin), column m  ==  xflat[cin, m + kh*Wp + kw].
    taps = jnp.stack(
        [xflat[:, :, kh * Wp + kw: kh * Wp + kw + M]
         for kh in range(KH) for kw in range(KW)],
        axis=1)                                       # (N, KH*KW, Cin, M)
    taps = taps.reshape(N, KH * KW * Cin, M)
    ones_row = jnp.ones((N, 1, M), dtype=taps.dtype)  # carries the BN shift
    x_full = jnp.concatenate([taps, ones_row], axis=1)        # (N, K, M)
    K = KH * KW * Cin + 1

    # Concatenate images along the lane axis: lane = n*M + m.
    x_slab = jnp.transpose(x_full, (1, 0, 2)).reshape(K, N * M)
    x_slab = x_slab.astype(jnp.bfloat16)

    # Fold BN into the weights (f32 fold, then bf16 cast).
    scale = (gamma / jnp.sqrt(running_var + eps)).astype(jnp.float32)
    shift = (beta + scale * (bias - running_mean)).astype(jnp.float32)
    w_mat = jnp.transpose(weight, (0, 2, 3, 1)).reshape(Cout, KH * KW * Cin)
    w_mat = w_mat.astype(jnp.float32) * scale[:, None]
    w_full = jnp.concatenate([w_mat, shift[:, None]], axis=1)  # (Cout, K)
    w_full = w_full.astype(jnp.bfloat16)

    # Lane tiling: >=2 parallel grid steps so both v7x TensorCores get work;
    # on v5e/v6e (1 TC) this is just a cheap 2-iteration loop.
    total_lanes = N * M
    if total_lanes % 256 == 0:
        lane_tile = total_lanes // 2
    else:
        lane_tile = total_lanes
    grid = (total_lanes // lane_tile,)

    flops = 2 * Cout * K * total_lanes
    bytes_accessed = (x_slab.size * 2 + w_full.size * 2
                      + Cout * total_lanes * 4)

    out = pl.pallas_call(
        _conv_bn_relu_kernel,
        out_shape=jax.ShapeDtypeStruct((Cout, total_lanes), jnp.float32),
        grid_spec=pltpu.PrefetchScalarGridSpec(
            num_scalar_prefetch=0,
            grid=grid,
            in_specs=[
                pl.BlockSpec((K, lane_tile), lambda i: (0, i)),
                pl.BlockSpec((Cout, K), lambda i: (0, 0)),
            ],
            out_specs=pl.BlockSpec((Cout, lane_tile), lambda i: (0, i)),
        ),
        compiler_params=pltpu.CompilerParams(
            dimension_semantics=("parallel",)),
        cost_estimate=pl.CostEstimate(flops=flops, transcendentals=0,
                                      bytes_accessed=bytes_accessed),
    )(x_slab, w_full)

    # Layout plumbing: de-interleave images, drop Wp-stride garbage columns.
    out = out.reshape(Cout, N, M).transpose(1, 0, 2)          # (N, Cout, M)
    out = out[:, :, :Ho * Wp].reshape(N, Cout, Ho, Wp)[:, :, :, :Wo]
    return out.astype(x.dtype)


def _reference(x, weight, bias, gamma, beta, running_mean, running_var,
               *, padding=1, eps=1e-3):
    """Pure-JAX reference (eval-mode BN) with the kernel's bf16 fold/rounding."""
    scale = gamma / jnp.sqrt(running_var + eps)
    shift = beta + scale * (bias - running_mean)
    wq = (weight.astype(jnp.float32) * scale[:, None, None, None]
          ).astype(jnp.bfloat16).astype(jnp.float32)
    sq = shift.astype(jnp.bfloat16).astype(jnp.float32)
    xq = x.astype(jnp.bfloat16).astype(jnp.float32)
    y = lax.conv_general_dilated(
        xq, wq, window_strides=(1, 1),
        padding=[(padding, padding), (padding, padding)],
        dimension_numbers=("NCHW", "OIHW", "NCHW"),
        precision=lax.Precision.HIGHEST)
    y = y + sq.reshape(1, -1, 1, 1)
    return jnp.maximum(y, 0.0)


if __name__ == "__main__":
    # _BasicConv2d(in_channels=4, out_channels=8, kernel_size=3, padding=1)
    N, Cin, H, W = 2, 4, 16, 16
    Cout, KH, KW = 8, 3, 3

    key = jax.random.PRNGKey(0)
    k0, k1, k2, k3, k4, k5, k6 = jax.random.split(key, 7)
    x = jax.random.normal(k0, (N, Cin, H, W), dtype=jnp.float32)
    weight = jax.random.normal(k1, (Cout, Cin, KH, KW), dtype=jnp.float32) * 0.1
    bias = jax.random.normal(k2, (Cout,), dtype=jnp.float32) * 0.1
    gamma = 1.0 + 0.1 * jax.random.normal(k3, (Cout,), dtype=jnp.float32)
    beta = 0.1 * jax.random.normal(k4, (Cout,), dtype=jnp.float32)
    running_mean = 0.1 * jax.random.normal(k5, (Cout,), dtype=jnp.float32)
    running_var = 0.5 + jnp.abs(jax.random.normal(k6, (Cout,), dtype=jnp.float32))

    out = basic_conv2d(x, weight, bias, gamma, beta, running_mean, running_var)
    out = jax.block_until_ready(out)

    ref = _reference(x, weight, bias, gamma, beta, running_mean, running_var)
    assert out.shape == (N, Cout, H, W), out.shape
    err = float(jnp.max(jnp.abs(out - ref)))
    assert err < 1e-3, err

    print("KERNEL_OK")
</pallas_src>

<mosaic_0001>
module attributes {stable_mosaic.version = 11 : i64} {
  func.func @_conv_bn_relu_kernel(%arg0: i32, %arg1: memref<37x384xbf16, #tpu.memory_space<vmem>>, %arg2: memref<8x37xbf16, #tpu.memory_space<vmem>>, %arg3: memref<8x384xf32, #tpu.memory_space<vmem>>) attributes {dimension_semantics = [#tpu.dimension_semantics<parallel>], iteration_bounds = array<i64: 2>, scalar_prefetch = 0 : i64, scratch_operands = 0 : i64, tpu.core_type = #tpu.core_type<tc>, window_params = [{transform_indices = @transform_0, window_bounds = array<i64: 37, 384>}, {pipeline_mode = #tpu.pipeline_mode<synchronous>, transform_indices = @transform_1, window_bounds = array<i64: 8, 37>}, {transform_indices = @transform_2, window_bounds = array<i64: 8, 384>}]} {
    %c0 = arith.constant 0 : index
    %c0_0 = arith.constant 0 : index
    %0 = vector.load %arg2[%c0, %c0_0] : memref<8x37xbf16, #tpu.memory_space<vmem>>, vector<8x37xbf16>
    %c0_1 = arith.constant 0 : index
    %c0_2 = arith.constant 0 : index
    %1 = vector.load %arg1[%c0_1, %c0_2] : memref<37x384xbf16, #tpu.memory_space<vmem>>, vector<37x384xbf16>
    %cst = arith.constant dense<0.000000e+00> : vector<8x384xf32>
    %2 = tpu.matmul %0, %1, %cst {dimension_numbers = #tpu.dot_dimension_numbers<[1], [0], [0], [1], [0, 0, 1, 1], [], []>} : vector<8x37xbf16>, vector<37x384xbf16>, vector<8x384xf32> -> vector<8x384xf32>
    %cst_3 = arith.constant 0.000000e+00 : f32
    %3 = vector.broadcast %cst_3 : f32 to vector<8x384xf32>
    %4 = arith.maximumf %2, %3 : vector<8x384xf32>
    %c0_4 = arith.constant 0 : index
    %c0_5 = arith.constant 0 : index
    %5 = vector.load %arg3[%c0_4, %c0_5] : memref<8x384xf32, #tpu.memory_space<vmem>>, vector<8x384xf32>
    tpu.vector_store %arg3[%c0_4, %c0_5], %4 {strides = array<i32>} : memref<8x384xf32, #tpu.memory_space<vmem>>, vector<8x384xf32>,
    return
  }
  func.func @transform_0(%arg0: i32) -> (i32, i32) {
    %c0_i32 = arith.constant 0 : i32
    %c0_i32_0 = arith.constant 0 : i32
    return %c0_i32, %arg0 : i32, i32
  }
  func.func @transform_1(%arg0: i32) -> (i32, i32) {
    %c0_i32 = arith.constant 0 : i32
    %c0_i32_0 = arith.constant 0 : i32
    %c0_i32_1 = arith.constant 0 : i32
    return %c0_i32, %c0_i32_0 : i32, i32
  }
  func.func @transform_2(%arg0: i32) -> (i32, i32) {
    %c0_i32 = arith.constant 0 : i32
    %c0_i32_0 = arith.constant 0 : i32
    return %c0_i32, %arg0 : i32, i32
  }
}

</mosaic_0001>

<bundles_post_ra>
// kernel: basic_conv2d.1
= control target key start
LH: loop header
LB: loop body
LE: loop exit
PB: predicated region body
PF: predicated region fallthrough
CT: control target
= control target key end

     0   :  { %s494_s9 = smov 0   ;;  %s496_s10 = smov 0   ;;  %s549_s0 = inlined_call_operand.vmem [shape: bf16[37,768], index: 0, kind: input, shape index: {}]   ;;  %s550_s1 = inlined_call_operand.vmem [shape: bf16[8,37], index: 1, kind: input, shape index: {}]   ;;  %s551_s2 = inlined_call_operand.vmem [shape: f32[8,768], index: 2, kind: output, shape index: {}]  }
   0x1   :  { %s498_s11 = smov 0  }
   0x2 LB: > { %s374_s12 = sadd.s32 4294967295, %s476_s11   ;;  %s511_s13 = sadd.s32 1, %s476_s11   ;;  %s476_s11 = sphi %s498_s11, %s554_s11   ;;  %s472_s10 = sphi %s496_s10, %s553_s10   ;;  %s468_s9 = sphi %s494_s9, %s552_s9  }
   0x3   : > { %s16_s14 = ssub.s32 %s476_s11, %s511_s13  ;;  %s19_s15 = sadd.s32 1, %s472_s10 }
   0x4   : > { %p17_p0 = scmp.eq.s32.totalorder %s16_s14, 0  ;;  %p26_p1 = scmp.ne.s32.totalorder %s472_s10, %s468_s9 }
   0x5   : > { %p27_p2 = scmp.eq.s32.totalorder %s476_s11, 0  ;;  %p377_p4 = scmp.ge.s32.totalorder %s476_s11, 2 }
   0x6   : > { %s520_s16 = scalar_select %p17_p0, %s472_s10, %s19_s15  }
   0x7   : > { %p28_p3 = por %p27_p2, %p26_p1  ;;  %102 = sbr.rel (%p377_p4) target bundleno = 27 (0x1b), region = 20 }
   0xc   : > { %105 = sbr.rel (!%p28_p3) target bundleno = 27 (0x1b), region = 24  ;;  %s107_s17 = sand.u32 (%p28_p3), 1, %s472_s10  }
   0xd   : > { %s420_s18 = smul.u32 (%p28_p3), 12, %s476_s11 }
   0xe   : > { %s427_s19 = smul.u32 (%p28_p3), 60, %s107_s17 }
   0xf   : > { %s112_s22 = scalar_lea.vmem (%p28_p3), %s549_s0, %s420_s18 }
  0x10   : > { %v127_v0 = vld [vmem:[%s112_s22] sm:$0xff] (%p28_p3)  ;;  %v129_v1 = vld [vmem:[%s112_s22 + $0x18] sm:$0xff] (%p28_p3)  ;;  %v131_v2 = vld [vmem:[%s112_s22 + $0x30] sm:$0xff] (%p28_p3)  ;;  %s109_s23 = scalar_lea.vmem (%p28_p3), [#allocation2], %s427_s19 }
  0x11   : > { %128 = vst [vmem:[%s109_s23] sm:$0xff] %v127_v0  ;;  %v133_v3 = vld [vmem:[%s112_s22 + $0x48] sm:$0xff]  ;;  %v135_v4 = vld [vmem:[%s112_s22 + $0x60] sm:$0xff]  ;;  %v383_v7 = vld [vmem:[%s112_s22 + $0x38] sm:$0xf] }
  0x12   : > { %130 = vst [vmem:[%s109_s23 + $0xc] sm:$0xff] %v129_v1  ;;  %v379_v5 = vld [vmem:[%s112_s22 + $0x8] sm:$0xf]  ;;  %v381_v6 = vld [vmem:[%s112_s22 + $0x20] sm:$0xf] }
  0x13   : > { %132 = vst [vmem:[%s109_s23 + $0x18] sm:$0xff] %v131_v2  ;;  %v385_v8 = vld [vmem:[%s112_s22 + $0x50] sm:$0xf]  ;;  %v387_v9 = vld [vmem:[%s112_s22 + $0x68] sm:$0xf] }
  0x14   : > { %134 = vst [vmem:[%s109_s23 + $0x24] sm:$0xff] %v133_v3 }
  0x15   : > { %136 = vst [vmem:[%s109_s23 + $0x30] sm:$0xff] %v135_v4 }
  0x16   : > { %380 = vst [vmem:[%s109_s23 + $0x8] sm:$0xf] %v379_v5 }
  0x17   : > { %382 = vst [vmem:[%s109_s23 + $0x14] sm:$0xf] %v381_v6 }
  0x18   : > { %384 = vst [vmem:[%s109_s23 + $0x20] sm:$0xf] %v383_v7 }
  0x19   : > { %386 = vst [vmem:[%s109_s23 + $0x2c] sm:$0xf] %v385_v8 }
  0x1a   : > { %388 = vst [vmem:[%s109_s23 + $0x38] sm:$0xf] %v387_v9 }
  0x1b PF: > { %p389_p5 = scmp.ge.s32.totalorder %s476_s11, 1  ;;  %p159_p6 = scmp.lt.s32.totalorder %s476_s11, 3 }
  0x1d   : > { %p160_p7 = pnand %p389_p5, %p159_p6 }
  0x1e   : > { %s166_s24 = sand.u32 (!%p160_p7), 1, %s468_s9   ;;  %s188_s29 = smul.u32 (!%p160_p7), 3, %s374_s12 }
  0x1f   : > { %163 = sbr.rel (%p160_p7) target bundleno = 195 (0xc3), region = 50 }
  0x20   : > { %s428_s25 = smul.u32 (!%p160_p7), 60, %s166_s24  ;;  %p189_p8 = scmp.lt.s32.totalorder (!%p160_p7), %s188_s29, 5 }
  0x22   : > { %s168_s26 = scalar_lea.vmem (!%p160_p7), [#allocation2], %s428_s25 }
  0x24   : > { %vm250_vm0 = vcmask 1041408   ;;  %vm251_vm1 = vcmask 1042432   ;;  %v478_v10 = vmov 65535   ;;  %v204_v12 = vld [vmem:[%s168_s26 + $0x30] sm:$0x77]  ;;  %vm246_vm2 = vcmask 302080  }
  0x25   : > { %v252_v11 = vsel %vm250_vm0, 4294967295, %v478_v10  ;;  %v205_v13 = vld [vmem:[%s168_s26 + $0x38] sm:$0x7]  ;;  %v228_v14 = vunpack.c.l.b16 %v204_v12  ;;  %v229_v15 = vunpack.c.h.b16 %v204_v12  ;;  %v425_v22 = vld [vmem:[%s168_s26 + $0x20] sm:$0xf0]  ;;  %s556_s29 = smov (!%p189_p8, %s188_s29), 5 }
  0x26   : > { %v230_v16 = vunpack.c.l.b16 %v205_v13  ;;  %v253_v17 = vsel %vm251_vm1, %v252_v11, 0  ;;  %v405_v21 = vld [vmem:[%s168_s26 + $0x18] sm:$0xf]  ;;  %v424_v23 = vld [vmem:[%s168_s26 + $0x1c] sm:$0xf]  ;;  %s390_s30 = sshll.u32 %s556_s29, 3 }
  0x27   : > { %v237_v18 = vpack.c.b16 %v228_v14, %v228_v14  ;;  %v238_v19 = vpack.c.b16 %v229_v15, %v229_v15  ;;  %v407_v24 = vld [vmem:[%s168_s26 + $0x24] sm:$0xf0]  ;;  %v413_v28 = vld [vmem:[%s168_s26 + $0x20] sm:$0xf]  ;;  %v426_v29 = vld [vmem:[%s168_s26 + $0x28] sm:$0xf0]  ;;  %v406_v30 = vor.u32 %v425_v22, %v405_v21  ;;  %s192_s5 = scalar_lea.vmem %s551_s2, %s390_s30 }
  0x28   : > { %v239_v20 = vpack.c.b16 %v230_v16, %v230_v16  ;;  %v410_v31 = vor.u32 %v424_v23, %v407_v24  ;;  %v393_v32 = vld [vmem:[%s168_s26] sm:$0xf]  ;;  %v414_v33 = vor.u32 %v426_v29, %v413_v28  ;;  %v422_v34 = vld [vmem:[%s168_s26 + $0x8] sm:$0xf0]  ;;  %v421_v35 = vld [vmem:[%s168_s26 + $0x4] sm:$0xf] }
  0x29   : > { %v255_v25 = vand.u32 %v253_v17, %v237_v18  ;;  %v258_v26 = vand.u32 %v253_v17, %v238_v19  ;;  %v395_v36 = vld [vmem:[%s168_s26 + $0xc] sm:$0xf0]  ;;  %v401_v37 = vld [vmem:[%s168_s26 + $0x8] sm:$0xf]  ;;  %v423_v38 = vld [vmem:[%s168_s26 + $0x10] sm:$0xf0]  ;;  %v394_v39 = vor.u32 %v422_v34, %v393_v32 }
  0x2a   : > { %v261_v27 = vand.u32 %v253_v17, %v239_v20  ;;  %v398_v40 = vor.u32 %v421_v35, %v395_v36  ;;  %v402_v41 = vor.u32 %v423_v38, %v401_v37  ;;  %v195_v42 = vld [vmem:[%s550_s1] sm:$0xf] }
  0x2b   : > { %268 = vmatpush.bf16.msra.mxu0 %v255_v25  ;;  %281 = vmatpush.bf16.msra.mxu1 %v258_v26 }
  0x2c   : > { %294 = vmatpush.bf16.msra.mxu2 %v261_v27 }
  0x2f   : > { %269 = vmatpush.bf16.msra.mxu0 %v406_v30  ;;  %282 = vmatpush.bf16.msra.mxu1 %v410_v31 }
  0x30   : > { %295 = vmatpush.bf16.msra.mxu2 %v414_v33 }
  0x33   : > { %270 = vmatpush.bf16.msra.mxu0 %v394_v39  ;;  %283 = vmatpush.bf16.msra.mxu1 %v398_v40 }
  0x34   : > { %296 = vmatpush.bf16.msra.mxu2 %v402_v41 }
  0x36   : > { %415 = vmatmul.msk.bf16.vlgmr.msra.gmra.mxu0 %vm246_vm2, %v195_v42  ;;  %416 = vmatmul.msk.bf16.vlgmr.msra.gmra.mxu1 %vm246_vm2, %v195_v42 }
  0x37   : > { %417 = vmatmul.msk.bf16.vlgmr.msra.gmra.mxu2 %vm246_vm2, %v195_v42 }
  0xb3   : > { %v272_v43 = vpop.f32.mrf.mxu0  ;;  %v285_v44 = vpop.f32.mrf.mxu1 }
  0xb4   : > { %v302_v45 = vmax.f32 %v272_v43, 0.0  ;;  %v303_v46 = vmax.f32 %v285_v44, 0.0 }
  0xb6   : > { %305 = vst [vmem:[%s192_s5] sm:$0xff] %v302_v45 }
  0xb7   : > { %306 = vst [vmem:[%s192_s5 + $0x8] sm:$0xff] %v303_v46 }
  0xba   : > { %v298_v47 = vpop.f32.mrf.mxu2 }
  0xbb   : > { %v304_v48 = vmax.f32 %v298_v47, 0.0  ;;  %v274_v49 = vpop.f32.mrf.mxu0  ;;  %v287_v50 = vpop.f32.mrf.mxu1 }
  0xbd   : > { %307 = vst [vmem:[%s192_s5 + $0x10] sm:$0xff] %v304_v48 }
  0xc2   : > { %v300_v51 = vpop.f32.mrf.mxu2 }
  0xc3 PF: > { %p9_p9 = scmp.ge.s32.totalorder %s511_s13, 4   ;;  %s552_s9 = smov %s472_s10 }
  0xc4   : > { %s553_s10 = smov %s520_s16  ;;  %s554_s11 = smov %s511_s13 }
  0xc5   :  { %11 = sbr.rel (!%p9_p9) target bundleno = 2 (0x2), region = 95 }

</bundles_post_ra>
